<compile_context>
chip_gen: v7x
topology: tpu7x:2x2x1
jax: 0.10.0
libtpu: 0.0.40
codegen_flags: <defaults>
</compile_context>

<pallas_src>
import functools

import jax
import jax.numpy as jnp
from jax.experimental import pallas as pl
from jax.experimental.pallas import tpu as pltpu


def _round_up(x, m):
    return ((x + m - 1) // m) * m


def _qfc_kernel(x_ref, w1_ref, b1_ref, w2_ref, b2_ref, w3_ref, b3_ref, o_ref):
    # x:  (TB, S)   f32 (cast to bf16 in-kernel)
    # w1: (S, 64)   bf16   b1: (1, 64)    f32
    # w2: (64, 64)  bf16   b2: (1, 64)    f32
    # w3: (64, 128) bf16   b3: (1, 128)   f32   (zero-padded from A to 128)
    # o:  (TB, 128) f32    (lane-dense slab; wrapper slices [:, :A])
    x = x_ref[...].astype(w1_ref.dtype)  # VPU cast, hidden under MXU issue
    y1 = jnp.dot(x, w1_ref[...], preferred_element_type=jnp.float32) + b1_ref[...]
    y1 = jnp.maximum(y1, 0.0)
    y2 = jnp.dot(y1.astype(w2_ref.dtype), w2_ref[...],
                 preferred_element_type=jnp.float32) + b2_ref[...]
    y2 = jnp.maximum(y2, 0.0)
    y = jnp.dot(y2.astype(w3_ref.dtype), w3_ref[...],
                preferred_element_type=jnp.float32) + b3_ref[...]
    o_ref[...] = y.astype(o_ref.dtype)


@functools.partial(jax.jit, static_argnames=("block_b",))
def q_fc_forward(x, params, *, block_b=4096):
    """x: (B, state_size) f32. params: dict w1,b1,w2,b2,w3,b3 (w* stored [in,out]).

    Returns (B, action_size) float32 Q-values.
    """
    B, S = x.shape
    H = params["w1"].shape[1]
    A = params["w3"].shape[1]

    # ---- batch tiling ------------------------------------------------------
    # Tile is a multiple of 8 (sublane), capped by block_b.  When the batch is
    # big enough for >= 2 tiles, cap the tile at ceil(B/2) so the grid has at
    # least 2 steps and the "parallel" axis can split across v7x's 2 TCs.
    block_b = _round_up(max(block_b, 8), 8)
    b_pad8 = _round_up(B, 8)
    if b_pad8 >= 16:
        TB = min(block_b, _round_up(pl.cdiv(b_pad8, 2), 8))
    else:
        TB = b_pad8
    TB = max(TB, 8)
    B_pad = _round_up(B, TB)

    x_p = x
    if B_pad != B:
        x_p = jnp.pad(x_p, ((0, B_pad - B), (0, 0)))

    grid = (B_pad // TB,)

    # ---- lane-dense output: pad final layer to 128 output columns ----------
    N_PAD = max(128, _round_up(A, 128))
    w1, b1 = params["w1"], params["b1"]
    w2, b2 = params["w2"], params["b2"]
    w3, b3 = params["w3"], params["b3"]
    if w3.shape[1] != N_PAD:
        w3 = jnp.pad(w3, ((0, 0), (0, N_PAD - w3.shape[1])))
        b3 = jnp.pad(b3, ((0, 0), (0, N_PAD - b3.shape[1])))

    def resident(shape):
        # Same block index every grid step -> stays in VMEM, DMA'd once.
        return pl.BlockSpec(shape, lambda i: tuple(0 for _ in shape))

    flops = 2 * B_pad * (S * H + H * H + H * N_PAD)
    bytes_accessed = (
        x_p.size * x_p.dtype.itemsize
        + sum(p.size * p.dtype.itemsize for p in (w1, b1, w2, b2, w3, b3))
        + B_pad * N_PAD * 4
    )

    out = pl.pallas_call(
        _qfc_kernel,
        out_shape=jax.ShapeDtypeStruct((B_pad, N_PAD), jnp.float32),
        grid=grid,
        in_specs=[
            pl.BlockSpec((TB, S), lambda i: (i, 0)),   # x: tiled over batch
            resident(w1.shape),
            resident(b1.shape),
            resident(w2.shape),
            resident(b2.shape),
            resident(w3.shape),
            resident(b3.shape),
        ],
        out_specs=pl.BlockSpec((TB, N_PAD), lambda i: (i, 0)),
        compiler_params=pltpu.CompilerParams(
            dimension_semantics=("parallel",),  # batch tiles across TCs (v7x)
        ),
        cost_estimate=pl.CostEstimate(
            flops=flops, transcendentals=0, bytes_accessed=bytes_accessed),
    )(x_p, w1, b1, w2, b2, w3, b3)

    return out[:B, :A]


def init_q_fc_params(key, state_size, action_size, hidden=64,
                     weight_dtype=jnp.bfloat16):
    """Mimics torch.nn.Linear default init U(-1/sqrt(fan_in), 1/sqrt(fan_in)).

    Weights stored as [in, out] (transpose of PyTorch) in `weight_dtype`
    (bf16 by default -> half the weight DMA bytes, f32 accumulation in-kernel).
    Biases stay f32 (added on the f32 accumulator).
    """
    keys = jax.random.split(key, 6)

    def linear(kw, kb, fan_in, fan_out):
        bound = 1.0 / jnp.sqrt(jnp.float32(fan_in))
        w = jax.random.uniform(kw, (fan_in, fan_out), jnp.float32, -bound, bound)
        b = jax.random.uniform(kb, (1, fan_out), jnp.float32, -bound, bound)
        return w.astype(weight_dtype), b

    w1, b1 = linear(keys[0], keys[1], state_size, hidden)
    w2, b2 = linear(keys[2], keys[3], hidden, hidden)
    w3, b3 = linear(keys[4], keys[5], hidden, action_size)
    return {"w1": w1, "b1": b1, "w2": w2, "b2": b2, "w3": w3, "b3": b3}


def q_fc_reference(x, p):
    """Pure-JAX reference with the same bf16-operand / f32-accumulate recipe."""
    cd = p["w1"].dtype
    y1 = jnp.dot(x.astype(cd), p["w1"], preferred_element_type=jnp.float32) + p["b1"]
    y1 = jnp.maximum(y1, 0.0)
    y2 = jnp.dot(y1.astype(cd), p["w2"], preferred_element_type=jnp.float32) + p["b2"]
    y2 = jnp.maximum(y2, 0.0)
    return jnp.dot(y2.astype(cd), p["w3"], preferred_element_type=jnp.float32) + p["b3"]


def q_fc_reference_f32(x, p):
    """Full-f32 reference (matches the original PyTorch semantics)."""
    y1 = jnp.maximum(x @ p["w1"].astype(jnp.float32) + p["b1"], 0.0)
    y2 = jnp.maximum(y1 @ p["w2"].astype(jnp.float32) + p["b2"], 0.0)
    return y2 @ p["w3"].astype(jnp.float32) + p["b3"]


if __name__ == "__main__":
    key = jax.random.PRNGKey(0)
    k_param, k_x1, k_x2 = jax.random.split(key, 3)

    state_size = 16
    action_size = 4
    params = init_q_fc_params(k_param, state_size, action_size)

    # --- small batch: single grid step, no padding -------------------------
    batch = 8
    x = jax.random.normal(k_x1, (batch, state_size), dtype=jnp.float32)
    out = jax.block_until_ready(q_fc_forward(x, params))
    assert out.shape == (batch, action_size)
    ref = q_fc_reference(x, params)
    ref32 = q_fc_reference_f32(x, params)
    assert jnp.allclose(out, ref, atol=2e-3, rtol=2e-3), "mismatch vs bf16 reference"
    assert jnp.allclose(out, ref32, atol=5e-2, rtol=5e-2), "mismatch vs f32 reference"

    # --- larger batch: exercises batch tiling + padding (grid > 1) ---------
    batch2 = 200
    x2 = jax.random.normal(k_x2, (batch2, state_size), dtype=jnp.float32)
    out2 = jax.block_until_ready(q_fc_forward(x2, params, block_b=64))
    assert out2.shape == (batch2, action_size)
    ref2 = q_fc_reference(x2, params)
    assert jnp.allclose(out2, ref2, atol=2e-3, rtol=2e-3), "tiled mismatch vs bf16 reference"

    print("KERNEL_OK")
</pallas_src>

<mosaic_0001>
module attributes {stable_mosaic.version = 11 : i64} {
  func.func @_qfc_kernel(%arg0: i32, %arg1: memref<8x16xf32, #tpu.memory_space<vmem>>, %arg2: memref<16x64xbf16, #tpu.memory_space<vmem>>, %arg3: memref<1x64xf32, #tpu.memory_space<vmem>>, %arg4: memref<64x64xbf16, #tpu.memory_space<vmem>>, %arg5: memref<1x64xf32, #tpu.memory_space<vmem>>, %arg6: memref<64x128xbf16, #tpu.memory_space<vmem>>, %arg7: memref<1x128xf32, #tpu.memory_space<vmem>>, %arg8: memref<8x128xf32, #tpu.memory_space<vmem>>) attributes {dimension_semantics = [#tpu.dimension_semantics<parallel>], iteration_bounds = array<i64: 1>, scalar_prefetch = 0 : i64, scratch_operands = 0 : i64, tpu.core_type = #tpu.core_type<tc>, window_params = [{transform_indices = @transform_0, window_bounds = array<i64: 8, 16>}, {pipeline_mode = #tpu.pipeline_mode<synchronous>, transform_indices = @transform_1, window_bounds = array<i64: 16, 64>}, {pipeline_mode = #tpu.pipeline_mode<synchronous>, transform_indices = @transform_2, window_bounds = array<i64: 1, 64>}, {pipeline_mode = #tpu.pipeline_mode<synchronous>, transform_indices = @transform_3, window_bounds = array<i64: 64, 64>}, {pipeline_mode = #tpu.pipeline_mode<synchronous>, transform_indices = @transform_4, window_bounds = array<i64: 1, 64>}, {pipeline_mode = #tpu.pipeline_mode<synchronous>, transform_indices = @transform_5, window_bounds = array<i64: 64, 128>}, {pipeline_mode = #tpu.pipeline_mode<synchronous>, transform_indices = @transform_6, window_bounds = array<i64: 1, 128>}, {transform_indices = @transform_7, window_bounds = array<i64: 8, 128>}]} {
    %c0 = arith.constant 0 : index
    %c0_0 = arith.constant 0 : index
    %0 = vector.load %arg1[%c0, %c0_0] : memref<8x16xf32, #tpu.memory_space<vmem>>, vector<8x16xf32>
    %1 = arith.truncf %0 : vector<8x16xf32> to vector<8x16xbf16>
    %c0_1 = arith.constant 0 : index
    %c0_2 = arith.constant 0 : index
    %2 = vector.load %arg2[%c0_1, %c0_2] : memref<16x64xbf16, #tpu.memory_space<vmem>>, vector<16x64xbf16>
    %cst = arith.constant dense<0.000000e+00> : vector<8x64xf32>
    %3 = tpu.matmul %1, %2, %cst {dimension_numbers = #tpu.dot_dimension_numbers<[1], [0], [0], [1], [0, 0, 1, 1], [], []>} : vector<8x16xbf16>, vector<16x64xbf16>, vector<8x64xf32> -> vector<8x64xf32>
    %c0_3 = arith.constant 0 : index
    %c0_4 = arith.constant 0 : index
    %4 = vector.load %arg3[%c0_3, %c0_4] : memref<1x64xf32, #tpu.memory_space<vmem>>, vector<1x64xf32>
    %5 = vector.broadcast %4 : vector<1x64xf32> to vector<8x64xf32>
    %6 = arith.addf %3, %5 : vector<8x64xf32>
    %cst_5 = arith.constant 0.000000e+00 : f32
    %7 = vector.broadcast %cst_5 : f32 to vector<8x64xf32>
    %8 = arith.maximumf %6, %7 : vector<8x64xf32>
    %9 = arith.truncf %8 : vector<8x64xf32> to vector<8x64xbf16>
    %c0_6 = arith.constant 0 : index
    %c0_7 = arith.constant 0 : index
    %10 = vector.load %arg4[%c0_6, %c0_7] : memref<64x64xbf16, #tpu.memory_space<vmem>>, vector<64x64xbf16>
    %cst_8 = arith.constant dense<0.000000e+00> : vector<8x64xf32>
    %11 = tpu.matmul %9, %10, %cst_8 {dimension_numbers = #tpu.dot_dimension_numbers<[1], [0], [0], [1], [0, 0, 1, 1], [], []>} : vector<8x64xbf16>, vector<64x64xbf16>, vector<8x64xf32> -> vector<8x64xf32>
    %c0_9 = arith.constant 0 : index
    %c0_10 = arith.constant 0 : index
    %12 = vector.load %arg5[%c0_9, %c0_10] : memref<1x64xf32, #tpu.memory_space<vmem>>, vector<1x64xf32>
    %13 = vector.broadcast %12 : vector<1x64xf32> to vector<8x64xf32>
    %14 = arith.addf %11, %13 : vector<8x64xf32>
    %cst_11 = arith.constant 0.000000e+00 : f32
    %15 = vector.broadcast %cst_11 : f32 to vector<8x64xf32>
    %16 = arith.maximumf %14, %15 : vector<8x64xf32>
    %17 = arith.truncf %16 : vector<8x64xf32> to vector<8x64xbf16>
    %c0_12 = arith.constant 0 : index
    %c0_13 = arith.constant 0 : index
    %18 = vector.load %arg6[%c0_12, %c0_13] : memref<64x128xbf16, #tpu.memory_space<vmem>>, vector<64x128xbf16>
    %cst_14 = arith.constant dense<0.000000e+00> : vector<8x128xf32>
    %19 = tpu.matmul %17, %18, %cst_14 {dimension_numbers = #tpu.dot_dimension_numbers<[1], [0], [0], [1], [0, 0, 1, 1], [], []>} : vector<8x64xbf16>, vector<64x128xbf16>, vector<8x128xf32> -> vector<8x128xf32>
    %c0_15 = arith.constant 0 : index
    %c0_16 = arith.constant 0 : index
    %20 = vector.load %arg7[%c0_15, %c0_16] : memref<1x128xf32, #tpu.memory_space<vmem>>, vector<1x128xf32>
    %21 = vector.broadcast %20 : vector<1x128xf32> to vector<8x128xf32>
    %22 = arith.addf %19, %21 : vector<8x128xf32>
    %c0_17 = arith.constant 0 : index
    %c0_18 = arith.constant 0 : index
    %23 = vector.load %arg8[%c0_17, %c0_18] : memref<8x128xf32, #tpu.memory_space<vmem>>, vector<8x128xf32>
    tpu.vector_store %arg8[%c0_17, %c0_18], %22 {strides = array<i32>} : memref<8x128xf32, #tpu.memory_space<vmem>>, vector<8x128xf32>,
    return
  }
  func.func @transform_0(%arg0: i32) -> (i32, i32) {
    %c0_i32 = arith.constant 0 : i32
    %c0_i32_0 = arith.constant 0 : i32
    return %arg0, %c0_i32 : i32, i32
  }
  func.func @transform_1(%arg0: i32) -> (i32, i32) {
    %c0_i32 = arith.constant 0 : i32
    %c0_i32_0 = arith.constant 0 : i32
    %c0_i32_1 = arith.constant 0 : i32
    return %c0_i32, %c0_i32_0 : i32, i32
  }
  func.func @transform_2(%arg0: i32) -> (i32, i32) {
    %c0_i32 = arith.constant 0 : i32
    %c0_i32_0 = arith.constant 0 : i32
    %c0_i32_1 = arith.constant 0 : i32
    return %c0_i32, %c0_i32_0 : i32, i32
  }
  func.func @transform_3(%arg0: i32) -> (i32, i32) {
    %c0_i32 = arith.constant 0 : i32
    %c0_i32_0 = arith.constant 0 : i32
    %c0_i32_1 = arith.constant 0 : i32
    return %c0_i32, %c0_i32_0 : i32, i32
  }
  func.func @transform_4(%arg0: i32) -> (i32, i32) {
    %c0_i32 = arith.constant 0 : i32
    %c0_i32_0 = arith.constant 0 : i32
    %c0_i32_1 = arith.constant 0 : i32
    return %c0_i32, %c0_i32_0 : i32, i32
  }
  func.func @transform_5(%arg0: i32) -> (i32, i32) {
    %c0_i32 = arith.constant 0 : i32
    %c0_i32_0 = arith.constant 0 : i32
    %c0_i32_1 = arith.constant 0 : i32
    return %c0_i32, %c0_i32_0 : i32, i32
  }
  func.func @transform_6(%arg0: i32) -> (i32, i32) {
    %c0_i32 = arith.constant 0 : i32
    %c0_i32_0 = arith.constant 0 : i32
    %c0_i32_1 = arith.constant 0 : i32
    return %c0_i32, %c0_i32_0 : i32, i32
  }
  func.func @transform_7(%arg0: i32) -> (i32, i32) {
    %c0_i32 = arith.constant 0 : i32
    %c0_i32_0 = arith.constant 0 : i32
    return %arg0, %c0_i32 : i32, i32
  }
}

</mosaic_0001>

<bundles_post_ra>
// kernel: q_fc_forward.1
= control target key start
LH: loop header
LB: loop body
LE: loop exit
PB: predicated region body
PF: predicated region fallthrough
CT: control target
= control target key end

     0   :  { %v330_v0 = vmov 0.0   ;;  %vm331_vm0 = vmmov 0   ;;  %vm44_vm1 = vcmask 130048   ;;  %vm129_vm2 = vcmask 523264   ;;  %s416_s1 = inlined_call_operand.vmem [shape: bf16[16,64], index: 1, kind: input, shape index: {}]   ;;  %s417_s0 = inlined_call_operand.vmem [shape: f32[8,16], index: 0, kind: input, shape index: {}]   ;;  %s418_s3 = inlined_call_operand.vmem [shape: bf16[64,64], index: 3, kind: input, shape index: {}]   ;;  %s419_s5 = inlined_call_operand.vmem [shape: bf16[64,128], index: 5, kind: input, shape index: {}]   ;;  %s420_s2 = inlined_call_operand.vmem [shape: f32[1,64], index: 2, kind: input, shape index: {}]   ;;  %s421_s4 = inlined_call_operand.vmem [shape: f32[1,64], index: 4, kind: input, shape index: {}]   ;;  %s422_s6 = inlined_call_operand.vmem [shape: f32[1,128], index: 6, kind: input, shape index: {}]   ;;  %s423_s7 = inlined_call_operand.vmem [shape: f32[8,128], index: 7, kind: output, shape index: {}]  }
   0x1   :  { %289 = vmatprep.subr.bf16.mxu0 %v330_v0  ;;  %v321_v1 = vld [vmem:[%s416_s1] sm:$0xff]   ;;  %291 = vmatprep.mubr.msk.bf16.mxu0 %vm331_vm0, %v330_v0  ;;  %v323_v5 = vld [vmem:[%s418_s3 + $0x8] sm:$0xff]   ;;  %v324_v6 = vld [vmem:[%s418_s3 + $0x10] sm:$0xff]  }
   0x2   :  { %v27_v2 = vld [vmem:[%s417_s0] sm:$0xff]  ;;  %295 = vmatprep.subr.bf16.mxu1 %v330_v0  ;;  %303 = vmatprep.mubr.msk.bf16.mxu1 %vm331_vm0, %v330_v0  ;;  %v325_v7 = vld [vmem:[%s418_s3 + $0x18] sm:$0xff]   ;;  %v327_v9 = vld [vmem:[%s419_s5 + $0x8] sm:$0xff]  }
   0x3   :  { %290 = vmatpush3.bf16.msra.mxu0 %v321_v1  ;;  %v28_v3 = vpack.c.bf16 %v27_v2, %v27_v2  ;;  %v322_v4 = vld [vmem:[%s418_s3] sm:$0xff]   ;;  %v328_v18 = vld [vmem:[%s419_s5 + $0x10] sm:$0xff]   ;;  %v329_v19 = vld [vmem:[%s419_s5 + $0x18] sm:$0xff]  }
   0x4   :  { %307 = vmatprep.subr.bf16.mxu0 %v330_v0  ;;  %296 = vmatpush3.bf16.msra.mxu1 %v322_v4  ;;  %v326_v8 = vld [vmem:[%s419_s5] sm:$0xff]  }
   0x5   :  { %297 = vmatprep.subr.bf16.mxu1 %v330_v0  ;;  %v262_v10 = vld [vmem:[%s420_s2] ss:$0 sm:$0xff] }
   0x6   :  { %292 = vmatmul.mubr.msk.bf16.vlgmr.msra.gmra.mrb[0].mxu0 %vm44_vm1, %v28_v3  ;;  %v265_v20 = vld [vmem:[%s421_s4] ss:$0 sm:$0xff] }
   0x7   :  { %315 = vmatprep.mubr.msk.bf16.mxu0 %vm331_vm0, %v330_v0  ;;  %308 = vmatpush3.bf16.msra.mxu0 %v326_v8  ;;  %v271_v28 = vld [vmem:[%s422_s6] ss:$0 sm:$0xff] }
   0x8   :  { %298 = vmatpush3.bf16.msra.mxu1 %v323_v5  ;;  %309 = vmatprep.subr.bf16.mxu0 %v330_v0 }
   0x9   :  { %299 = vmatprep.subr.bf16.mxu1 %v330_v0 }
   0xb   :  { %310 = vmatpush3.bf16.msra.mxu0 %v327_v9 }
   0xc   :  { %300 = vmatpush3.bf16.msra.mxu1 %v324_v6  ;;  %311 = vmatprep.subr.bf16.mxu0 %v330_v0 }
   0xd   :  { %301 = vmatprep.subr.bf16.mxu1 %v330_v0 }
   0xf   :  { %312 = vmatpush3.bf16.msra.mxu0 %v328_v18 }
  0x10   :  { %302 = vmatpush3.bf16.msra.mxu1 %v325_v7  ;;  %313 = vmatprep.subr.bf16.mxu0 %v330_v0 }
  0x13   :  { %314 = vmatpush3.bf16.msra.mxu0 %v329_v19 }
  0xd9   :  { %v82_v11 = vpop.f32.mrb[0].mxu0 }
  0xda   :  { %v83_v12 = vadd.f32 %v262_v10, %v82_v11  ;;  %v293_v13 = vpop.f32.mrb[1].mxu0 }
  0xdb   :  { %v85_v14 = vpop.f32.mrb[2].mxu0 }
  0xdc   :  { %v88_v15 = vmax.f32 %v83_v12, 0.0  ;;  %v294_v16 = vpop.f32.mrb[3].mxu0 }
  0xde   :  { %v89_v17 = vpack.c.bf16 %v88_v15, %v88_v15 }
  0xe0   :  { %304 = vmatmul.mubr.msk.bf16.vlgmr.msra.gmra.mrb[0].mxu1 %vm129_vm2, %v89_v17 }
 0x1b3   :  { %v167_v21 = vpop.f32.mrb[0].mxu1 }
 0x1b4   :  { %v168_v22 = vadd.f32 %v265_v20, %v167_v21  ;;  %v305_v23 = vpop.f32.mrb[1].mxu1 }
 0x1b5   :  { %v170_v24 = vpop.f32.mrb[2].mxu1 }
 0x1b6   :  { %v173_v25 = vmax.f32 %v168_v22, 0.0  ;;  %v306_v26 = vpop.f32.mrb[3].mxu1 }
 0x1b8   :  { %v174_v27 = vpack.c.bf16 %v173_v25, %v173_v25 }
 0x1ba   :  { %316 = vmatmul.mubr.msk.bf16.vlgmr.msra.gmra.mrb[4].mxu0 %vm129_vm2, %v174_v27 }
 0x28d   :  { %v251_v29 = vpop.f32.mrb[4].mxu0 }
 0x28e   :  { %v252_v30 = vadd.f32 %v271_v28, %v251_v29  ;;  %v317_v31 = vpop.f32.mrb[5].mxu0 }
 0x28f   :  { %v254_v32 = vpop.f32.mrb[6].mxu0 }
 0x290   :  { %257 = vst [vmem:[%s423_s7] sm:$0xff] %v252_v30  ;;  %v318_v33 = vpop.f32.mrb[7].mxu0 }

</bundles_post_ra>
